<compile_context>
chip_gen: v7x
topology: tpu7x:2x2x1
jax: 0.10.0
libtpu: 0.0.40
codegen_flags: <defaults>
</compile_context>

<pallas_src>
import jax
import jax.numpy as jnp
from jax.experimental import pallas as pl
from jax.experimental.pallas import tpu as pltpu


def _passthrough_kernel(x_hbm_ref, m_hbm_ref, x_out_ref, m_out_ref, flag_ref):
    # Outputs alias the inputs' HBM buffers (input_output_aliases), so the
    # data is already in place: no DMA, no VMEM bounce, no VPU copy.
    # The single SMEM scalar store below just gives the kernel a well-defined
    # (scalar-path, effectively free) body; it touches no tensor data.
    del x_hbm_ref, m_hbm_ref, x_out_ref, m_out_ref
    flag_ref[0] = jnp.int32(1)


def base_frontend_forward(inputs, inputs_mask):
    """Identity front-end: returns (inputs, inputs_mask).

    inputs:       [B, T, D]  (batch, time, feature)
    inputs_mask:  [B, T]     validity mask

    Implemented as a zero-copy pallas_call: operands are left in HBM
    (memory_space=pl.ANY) and each output aliases its corresponding input
    buffer, so the kernel moves no data.
    """
    B, T, D = inputs.shape
    assert inputs_mask.shape == (B, T)

    return pl.pallas_call(
        _passthrough_kernel,
        out_shape=(
            jax.ShapeDtypeStruct((B, T, D), inputs.dtype),
            jax.ShapeDtypeStruct((B, T), inputs_mask.dtype),
        ),
        in_specs=[
            pl.BlockSpec(memory_space=pl.ANY),
            pl.BlockSpec(memory_space=pl.ANY),
        ],
        out_specs=(
            pl.BlockSpec(memory_space=pl.ANY),
            pl.BlockSpec(memory_space=pl.ANY),
        ),
        scratch_shapes=[pltpu.SMEM((1,), jnp.int32)],
        # Input i's buffer is reused as output i's buffer -> no HBM traffic
        # generated by the kernel itself.
        input_output_aliases={0: 0, 1: 1},
    )(inputs, inputs_mask)


def base_frontend_inference(inputs, inputs_mask):
    # Mirrors BaseFrontEnd.inference: just calls forward.
    return base_frontend_forward(inputs, inputs_mask)


if __name__ == "__main__":
    key = jax.random.PRNGKey(0)
    k_x, k_m = jax.random.split(key)

    B, T, D = 2, 8, 32
    inputs = jax.random.normal(k_x, (B, T, D), dtype=jnp.float32)
    # 0/1 validity mask, deterministic.
    inputs_mask = (jax.random.uniform(k_m, (B, T)) > 0.2).astype(jnp.float32)

    out, out_mask = base_frontend_inference(inputs, inputs_mask)
    out = jax.block_until_ready(out)
    out_mask = jax.block_until_ready(out_mask)

    # Identity semantics check (bit-exact).
    assert out.shape == (B, T, D) and out.dtype == inputs.dtype
    assert out_mask.shape == (B, T) and out_mask.dtype == inputs_mask.dtype
    assert jnp.array_equal(out, inputs)
    assert jnp.array_equal(out_mask, inputs_mask)

    print("KERNEL_OK")
</pallas_src>

<mosaic_0001>
module attributes {stable_mosaic.version = 11 : i64} {
  func.func @_passthrough_kernel(%arg0: memref<2x8x32xf32, #tpu.memory_space<any>>, %arg1: memref<2x8xf32, #tpu.memory_space<any>>, %arg2: memref<2x8x32xf32, #tpu.memory_space<any>>, %arg3: memref<2x8xf32, #tpu.memory_space<any>>, %arg4: memref<1xi32, #tpu.memory_space<smem>>) attributes {dimension_semantics = [], scalar_prefetch = 0 : i64, scratch_operands = 1 : i64, tpu.core_type = #tpu.core_type<tc>} {
    %c1_i32 = arith.constant 1 : i32
    %c0 = arith.constant 0 : index
    %0 = memref.load %arg4[%c0] : memref<1xi32, #tpu.memory_space<smem>>
    memref.store %c1_i32, %arg4[%c0] : memref<1xi32, #tpu.memory_space<smem>>
    return
  }
}

</mosaic_0001>

<bundles_post_ra>
// kernel: tpu_custom_call.1
= control target key start
LH: loop header
LB: loop body
LE: loop exit
PB: predicated region body
PF: predicated region fallthrough
CT: control target
= control target key end

     0   :  { %s31_s0 = inlined_call_operand.hbm [shape: f32[2,8,32], index: 0, kind: input, shape index: {}, may-alias: {0,2}]   ;;  %s32_s1 = inlined_call_operand.hbm [shape: f32[2,8], index: 1, kind: input, shape index: {}, may-alias: {1,3}]   ;;  %s33_s2 = inlined_call_operand.hbm [shape: f32[2,8,32], index: 2, kind: output, shape index: {0}, may-alias: {0,2}]   ;;  %s34_s3 = inlined_call_operand.hbm [shape: f32[2,8], index: 3, kind: output, shape index: {1}, may-alias: {1,3}]  }

</bundles_post_ra>
